<compile_context>
chip_gen: v7x
topology: tpu7x:2x2x1
jax: 0.10.0
libtpu: 0.0.40
codegen_flags: <defaults>
</compile_context>

<pallas_src>
import functools

import jax
import jax.numpy as jnp
from jax.experimental import pallas as pl
from jax.experimental.pallas import tpu as pltpu


def _round_up(x, m):
    return ((x + m - 1) // m) * m


def _choose_tile(dim, align, candidates):
    """Pick a tile from `candidates` (all multiples of `align`) minimizing the
    padded size of `dim`; ties prefer the larger tile.  Returns (tile, padded)."""
    d_aligned = _round_up(dim, align)
    best = None
    for t in candidates:
        if t % align != 0:
            continue
        padded = _round_up(d_aligned, t)
        key = (padded - dim, -t)
        if best is None or key < best[0]:
            best = (key, t, padded)
    # Fallback: the aligned dim itself is always a legal single tile.
    if best is None:
        return d_aligned, d_aligned
    return best[1], best[2]


# ---------------------------------------------------------------------------
# Kernels
# ---------------------------------------------------------------------------
def linear_kernel_f32_out(x_ref, w_ref, b_ref, o_ref):
    """f32 output: accumulate straight into o_ref (no scratch, no finalize)."""
    k = pl.program_id(2)

    @pl.when(k == 0)
    def _init():
        # Fold the bias into the accumulator instead of a separate add.
        o_ref[...] = jnp.broadcast_to(b_ref[...], o_ref.shape)

    o_ref[...] += jnp.dot(
        x_ref[...], w_ref[...], preferred_element_type=jnp.float32
    )


def linear_kernel_lowp_out(x_ref, w_ref, b_ref, o_ref, acc_ref):
    """Low-precision output: f32 VMEM accumulator, cast on the last K step."""
    k = pl.program_id(2)

    @pl.when(k == 0)
    def _init():
        acc_ref[...] = jnp.broadcast_to(b_ref[...], acc_ref.shape)

    acc_ref[...] += jnp.dot(
        x_ref[...], w_ref[...], preferred_element_type=jnp.float32
    )

    @pl.when(k == pl.num_programs(2) - 1)
    def _finalize():
        o_ref[...] = acc_ref[...].astype(o_ref.dtype)


# ---------------------------------------------------------------------------
# Parameter preparation (hoisted out of the forward path)
# ---------------------------------------------------------------------------
def prepare_encoder_linear(w, b, *, compute_dtype=jnp.bfloat16):
    """Cast + pad the Linear weights once, pick N/K tiles from the layer shape.

    w: [D, N]  (already [in, out]; torch stores [out, in])
    b: [N]
    """
    D, N = w.shape

    tn, N_pad = _choose_tile(N, 128, (1024, 512, 256, 128))
    tk, D_pad = _choose_tile(D, 128, (2048, 1024, 512, 256, 128))

    w2 = w.astype(compute_dtype)
    if (D_pad, N_pad) != (D, N):
        w2 = jnp.pad(w2, ((0, D_pad - D), (0, N_pad - N)))
    b2 = b.astype(jnp.float32).reshape(1, N)
    if N_pad != N:
        b2 = jnp.pad(b2, ((0, 0), (0, N_pad - N)))

    return {
        "w": w2, "b": b2,
        "D": D, "N": N, "D_pad": D_pad, "N_pad": N_pad,
        "tn": tn, "tk": tk,
        "compute_dtype": jnp.dtype(compute_dtype),
    }


# ---------------------------------------------------------------------------
# Forward
# ---------------------------------------------------------------------------
def encoder_block_linear(x, params):
    """Pallas forward for torch.nn.Linear(dimension, linear_layer_dim).

    x: [B, S, D]; returns [B, S, N] in x's dtype.
    """
    B, S, D = x.shape
    assert D == params["D"], f"feature dim {D} != weight in-dim {params['D']}"
    M = B * S
    N, N_pad, D_pad = params["N"], params["N_pad"], params["D_pad"]
    tn, tk = params["tn"], params["tk"]
    compute_dtype = params["compute_dtype"]
    out_dtype = x.dtype

    # Sublane packing of the compute dtype sets the row alignment.
    sub = {1: 32, 2: 16}.get(compute_dtype.itemsize, 8)
    tm, M_pad = _choose_tile(M, sub, (256, 128, 64, 32, 16, 8))

    x2 = x.astype(compute_dtype).reshape(M, D)
    if (M_pad, D_pad) != (M, D):
        x2 = jnp.pad(x2, ((0, M_pad - M), (0, D_pad - D)))  # zero K-pad is exact

    grid = (M_pad // tm, N_pad // tn, D_pad // tk)

    f32_out = out_dtype == jnp.float32
    kernel = linear_kernel_f32_out if f32_out else linear_kernel_lowp_out
    scratch = [] if f32_out else [pltpu.VMEM((tm, tn), jnp.float32)]

    # Explicit VMEM budget: double-buffered inputs + output (+ scratch).
    c_bytes = compute_dtype.itemsize
    o_bytes = jnp.dtype(out_dtype).itemsize
    vmem_est = (2 * (tm * tk * c_bytes + tk * tn * c_bytes + 8 * tn * 4)
                + 2 * tm * tn * o_bytes
                + (0 if f32_out else tm * tn * 4))
    vmem_limit = int(min(64 * 2**20, max(int(vmem_est * 1.5), 16 * 2**20)))

    out2 = pl.pallas_call(
        kernel,
        out_shape=jax.ShapeDtypeStruct((M_pad, N_pad), out_dtype),
        grid_spec=pltpu.PrefetchScalarGridSpec(
            num_scalar_prefetch=0,
            grid=grid,
            in_specs=[
                pl.BlockSpec((tm, tk), lambda i, j, k: (i, k)),  # x tile
                pl.BlockSpec((tk, tn), lambda i, j, k: (k, j)),  # w tile
                pl.BlockSpec((1, tn), lambda i, j, k: (0, j)),   # bias tile
            ],
            out_specs=pl.BlockSpec((tm, tn), lambda i, j, k: (i, j)),
            scratch_shapes=scratch,
        ),
        compiler_params=pltpu.CompilerParams(
            dimension_semantics=("parallel", "parallel", "arbitrary"),
            vmem_limit_bytes=vmem_limit,
        ),
    )(x2, params["w"], params["b"])

    return out2[:M, :N].reshape(B, S, N)


def init_encoder_block_params(key, dimension, linear_layer_dim):
    """Deterministic init mirroring torch.nn.Linear default (+/- 1/sqrt(in))."""
    k_w, k_b = jax.random.split(key)
    bound = 1.0 / jnp.sqrt(jnp.float32(dimension))
    # torch stores weight as [out, in]; we keep [in, out] for a lane-dense matmul.
    w = jax.random.uniform(k_w, (dimension, linear_layer_dim),
                           minval=-bound, maxval=bound, dtype=jnp.float32)
    b = jax.random.uniform(k_b, (linear_layer_dim,),
                           minval=-bound, maxval=bound, dtype=jnp.float32)
    return w, b


if __name__ == "__main__":
    # Module defaults: dimension=512, heads=8, linear_layer_dim=1024.
    dimension, heads, linear_layer_dim = 512, 8, 1024
    batch, seq = 2, 8

    key = jax.random.PRNGKey(0)
    k_x, k_p = jax.random.split(key)

    x = jax.random.normal(k_x, (batch, seq, dimension), dtype=jnp.float32)
    w, b = init_encoder_block_params(k_p, dimension, linear_layer_dim)

    ref = x @ w + b

    # Default path: bf16 compute (MXU peak), f32 accumulation, params
    # cast/padded once up front.  Grid is (1, 1, 1) for this shape.
    params_bf16 = prepare_encoder_linear(w, b, compute_dtype=jnp.bfloat16)
    out = jax.block_until_ready(encoder_block_linear(x, params_bf16))
    assert out.shape == (batch, seq, linear_layer_dim)
    assert jnp.allclose(out, ref, atol=5e-2, rtol=5e-2)

    # Optional f32 compute path (matches torch.nn.Linear numerics tightly).
    params_f32 = prepare_encoder_linear(w, b, compute_dtype=jnp.float32)
    out_f32 = jax.block_until_ready(encoder_block_linear(x, params_f32))
    assert jnp.allclose(out_f32, ref, atol=1e-4, rtol=1e-4)

    print("KERNEL_OK")
</pallas_src>

<mosaic_0001>
module attributes {stable_mosaic.version = 11 : i64} {
  func.func @linear_kernel_f32_out(%arg0: i32, %arg1: i32, %arg2: i32, %arg3: memref<16x512xbf16, #tpu.memory_space<vmem>>, %arg4: memref<512x1024xbf16, #tpu.memory_space<vmem>>, %arg5: memref<1x1024xf32, #tpu.memory_space<vmem>>, %arg6: memref<16x1024xf32, #tpu.memory_space<vmem>>) attributes {dimension_semantics = [#tpu.dimension_semantics<parallel>, #tpu.dimension_semantics<parallel>, #tpu.dimension_semantics<arbitrary>], iteration_bounds = array<i64: 1, 1, 1>, scalar_prefetch = 0 : i64, scratch_operands = 0 : i64, tpu.core_type = #tpu.core_type<tc>, window_params = [{transform_indices = @transform_0, window_bounds = array<i64: 16, 512>}, {transform_indices = @transform_1, window_bounds = array<i64: 512, 1024>}, {transform_indices = @transform_2, window_bounds = array<i64: 1, 1024>}, {transform_indices = @transform_3, window_bounds = array<i64: 16, 1024>}]} {
    %c0_i32 = arith.constant 0 : i32
    %0 = arith.cmpi eq, %arg2, %c0_i32 : i32
    %1 = arith.extui %0 : i1 to i32
    %c0_i32_0 = arith.constant 0 : i32
    %2 = arith.cmpi ne, %1, %c0_i32_0 : i32
    scf.if %2 {
      %c0_8 = arith.constant 0 : index
      %c0_9 = arith.constant 0 : index
      %9 = vector.load %arg5[%c0_8, %c0_9] : memref<1x1024xf32, #tpu.memory_space<vmem>>, vector<1x1024xf32>
      %10 = vector.shape_cast %9 : vector<1x1024xf32> to vector<1x1024xf32>
      %11 = vector.broadcast %10 : vector<1x1024xf32> to vector<16x1024xf32>
      %c0_10 = arith.constant 0 : index
      %c0_11 = arith.constant 0 : index
      %12 = vector.load %arg6[%c0_10, %c0_11] : memref<16x1024xf32, #tpu.memory_space<vmem>>, vector<16x1024xf32>
      tpu.vector_store %arg6[%c0_10, %c0_11], %11 {strides = array<i32>} : memref<16x1024xf32, #tpu.memory_space<vmem>>, vector<16x1024xf32>,
    } else {
    }
    %c0 = arith.constant 0 : index
    %c0_1 = arith.constant 0 : index
    %3 = vector.load %arg6[%c0, %c0_1] : memref<16x1024xf32, #tpu.memory_space<vmem>>, vector<16x1024xf32>
    %c0_2 = arith.constant 0 : index
    %c0_3 = arith.constant 0 : index
    %4 = vector.load %arg3[%c0_2, %c0_3] : memref<16x512xbf16, #tpu.memory_space<vmem>>, vector<16x512xbf16>
    %c0_4 = arith.constant 0 : index
    %c0_5 = arith.constant 0 : index
    %5 = vector.load %arg4[%c0_4, %c0_5] : memref<512x1024xbf16, #tpu.memory_space<vmem>>, vector<512x1024xbf16>
    %cst = arith.constant dense<0.000000e+00> : vector<16x1024xf32>
    %6 = tpu.matmul %4, %5, %cst {dimension_numbers = #tpu.dot_dimension_numbers<[1], [0], [0], [1], [0, 0, 1, 1], [], []>} : vector<16x512xbf16>, vector<512x1024xbf16>, vector<16x1024xf32> -> vector<16x1024xf32>
    %7 = arith.addf %3, %6 : vector<16x1024xf32>
    %c0_6 = arith.constant 0 : index
    %c0_7 = arith.constant 0 : index
    %8 = vector.load %arg6[%c0_6, %c0_7] : memref<16x1024xf32, #tpu.memory_space<vmem>>, vector<16x1024xf32>
    tpu.vector_store %arg6[%c0_6, %c0_7], %7 {strides = array<i32>} : memref<16x1024xf32, #tpu.memory_space<vmem>>, vector<16x1024xf32>,
    return
  }
  func.func @transform_0(%arg0: i32, %arg1: i32, %arg2: i32) -> (i32, i32) {
    %c0_i32 = arith.constant 0 : i32
    return %arg0, %arg2 : i32, i32
  }
  func.func @transform_1(%arg0: i32, %arg1: i32, %arg2: i32) -> (i32, i32) {
    %c0_i32 = arith.constant 0 : i32
    return %arg2, %arg1 : i32, i32
  }
  func.func @transform_2(%arg0: i32, %arg1: i32, %arg2: i32) -> (i32, i32) {
    %c0_i32 = arith.constant 0 : i32
    %c0_i32_0 = arith.constant 0 : i32
    return %c0_i32, %arg1 : i32, i32
  }
  func.func @transform_3(%arg0: i32, %arg1: i32, %arg2: i32) -> (i32, i32) {
    %c0_i32 = arith.constant 0 : i32
    return %arg0, %arg1 : i32, i32
  }
}

</mosaic_0001>

<bundles_post_ra>
// kernel: tpu_custom_call.1
= control target key start
LH: loop header
LB: loop body
LE: loop exit
PB: predicated region body
PF: predicated region fallthrough
CT: control target
= control target key end

     0   :  { %8 = vsyncpa [#allocation3], 0  ;;  %s2574_s0 = inlined_call_operand.hbm [shape: bf16[16,512], index: 0, kind: input, shape index: {}]   ;;  %s2575_s1 = inlined_call_operand.hbm [shape: bf16[512,1024], index: 1, kind: input, shape index: {}]   ;;  %s2576_s2 = inlined_call_operand.hbm [shape: f32[1,1024], index: 2, kind: input, shape index: {}]   ;;  %s2577_s3 = inlined_call_operand.hbm [shape: f32[16,1024], index: 3, kind: output, shape index: {}]  }
   0x1   :  { %9 = vsyncpa [#allocation6], 0 }
   0x2   :  { %10 = vsyncpa [#allocation4], 0  ;;  %s2472_s12 = smov [#allocation5]   ;;  %s2378_s16 = scalar_lea.hbm %s2575_s1, 32768 }
   0x3   :  { %s28_s13 = sshll.u32 %s2472_s12, 4  ;;  %p2379_p0 = scmp.ne.s32.totalorder %s2575_s1, %s2378_s16  ;;  %s29_s13 = int_to_ptr.vmem [resolvable:$true] %s28_s13 }
   0x4   :  { %p2382_p1 = scmp.lt.u32.totalorder %s2378_s16, %s2575_s1 }
   0x6   :  { %p2384_p2 = pnand %p2382_p1, %p2379_p0 }
   0x8   :  { %2387 = shalt.err (!%p2384_p2)
}
   0x9   :  { %s2388_s21 = scalar_lea.vmem %s29_s13, 32768  ;;  %p2393_p4 = scmp.lt.s32.totalorder %s29_s13, %s29_s13 }
   0xa   :  { %p2389_p3 = scmp.ne.s32.totalorder %s29_s13, %s2388_s21  ;;  %p2394_p5 = scmp.lt.s32.totalorder %s2388_s21, %s2388_s21 }
   0xc   :  { %p2395_p6 = por %p2394_p5, %p2393_p4 }
   0xe   :  { %p2396_p7 = pnand %p2395_p6, %p2389_p3 }
  0x10   :  { %2399 = shalt.err (!%p2396_p7)
}
  0x11   :  { %s2473_s22 = smov 512   ;;  %s2474_s23 = smov 32  }
  0x12   :  { %34 = dma.hbm_to_vmem [thread:$0]  %s2575_s1, 32768, %s29_s13, [#allocation6], %s2473_s22, %s2473_s22, %s2474_s23  }
  0x13   :  { %s2475_s26 = smov [#allocation2]   ;;  %s2400_s30 = scalar_lea.hbm %s2574_s0, 512 }
  0x14   :  { %s16_s27 = sshll.u32 %s2475_s26, 4  ;;  %p2401_p8 = scmp.ne.s32.totalorder %s2574_s0, %s2400_s30  ;;  %s17_s27 = int_to_ptr.vmem [resolvable:$true] %s16_s27 }
  0x15   :  { %p2404_p9 = scmp.lt.u32.totalorder %s2400_s30, %s2574_s0 }
  0x17   :  { %p2406_p10 = pnand %p2404_p9, %p2401_p8 }
  0x19   :  { %2409 = shalt.err (!%p2406_p10)
}
  0x1a   :  { %s2410_s8 = scalar_lea.vmem %s17_s27, 512  ;;  %p2415_p12 = scmp.lt.s32.totalorder %s17_s27, %s17_s27 }
  0x1b   :  { %p2411_p11 = scmp.ne.s32.totalorder %s17_s27, %s2410_s8  ;;  %p2416_p13 = scmp.lt.s32.totalorder %s2410_s8, %s2410_s8 }
  0x1d   :  { %p2417_p0 = por %p2416_p13, %p2415_p12 }
  0x1f   :  { %p2418_p1 = pnand %p2417_p0, %p2411_p11 }
  0x21   :  { %2421 = shalt.err (!%p2418_p1)
}
  0x22   :  { %s2476_s1 = smov 256   ;;  %s2477_s9 = smov 16  }
  0x23   :  { %22 = dma.hbm_to_vmem [thread:$0]  %s2574_s0, 512, %s17_s27, [#allocation3], %s2476_s1, %s2476_s1, %s2477_s9  }
  0x24   :  { %s2478_s12 = smov [#allocation7]   ;;  %s2422_s16 = scalar_lea.hbm %s2576_s2, 128 }
  0x25   :  { %s41_s13 = sshll.u32 %s2478_s12, 4  ;;  %p2423_p2 = scmp.ne.s32.totalorder %s2576_s2, %s2422_s16  ;;  %s42_s13 = int_to_ptr.vmem [resolvable:$true] %s41_s13 }
  0x26   :  { %p2426_p3 = scmp.lt.u32.totalorder %s2422_s16, %s2576_s2 }
  0x28   :  { %p2428_p4 = pnand %p2426_p3, %p2423_p2 }
  0x2a   :  { %2431 = shalt.err (!%p2428_p4)
}
  0x2b   :  { %s2432_s21 = scalar_lea.vmem %s42_s13, 128  ;;  %p2437_p6 = scmp.lt.s32.totalorder %s42_s13, %s42_s13 }
  0x2c   :  { %p2433_p5 = scmp.ne.s32.totalorder %s42_s13, %s2432_s21  ;;  %p2438_p7 = scmp.lt.s32.totalorder %s2432_s21, %s2432_s21 }
  0x2e   :  { %p2439_p8 = por %p2438_p7, %p2437_p6 }
  0x30   :  { %p2440_p9 = pnand %p2439_p8, %p2433_p5 }
  0x32   :  { %2443 = shalt.err (!%p2440_p9)
}
  0x33   :  { %44 = dma.hbm_to_vmem [thread:$0]  %s2576_s2, 128, %s42_s13, [#allocation6]  }
  0x34   :  { %2466 = dma.done.wait [#allocation3], 512  }
  0x35   :  { %2467 = vsyncadd [#allocation3], 4294966784 }
  0x36   :  { %2468 = dma.done.wait [#allocation6], 32896  }
  0x37   :  { %2469 = vsyncadd [#allocation6], 4294934400  ;;  %v136_v0 = vld [vmem:[#allocation5] sm:$0xff]  ;;  %v137_v2 = vld [vmem:[#allocation5 + $0x8] sm:$0xff]  ;;  %s2479_s2 = smov [#allocation8]  }
  0x38   :  { %v140_v1 = vld [vmem:[#allocation5 + $0x20] sm:$0xff]  ;;  %v141_v4 = vld [vmem:[#allocation5 + $0x28] sm:$0xff]  ;;  %s2073_s23 = sshll.u32 %s2479_s2, 4  ;;  %s2074_s23 = int_to_ptr.vmem [resolvable:$true] %s2073_s23 }
  0x39   :  { %v2091_v3 = vcombine.high %v136_v0, %v140_v1  ;;  %v2090_v5 = vcombine.low %v136_v0, %v140_v1  ;;  %v144_v6 = vld [vmem:[#allocation5 + $0x40] sm:$0xff]  ;;  %v2093_v8 = vcombine.high %v137_v2, %v141_v4  ;;  %v2092_v9 = vcombine.low %v137_v2, %v141_v4  ;;  %v145_v11 = vld [vmem:[#allocation5 + $0x48] sm:$0xff]  ;;  %s2444_s24 = scalar_lea.vmem %s2074_s23, 2048  ;;  %p2449_p11 = scmp.lt.s32.totalorder %s2074_s23, %s2074_s23 }
  0x3a   :  { %v148_v7 = vld [vmem:[#allocation5 + $0x60] sm:$0xff]  ;;  %v149_v12 = vld [vmem:[#allocation5 + $0x68] sm:$0xff]  ;;  %p2445_p10 = scmp.ne.s32.totalorder %s2074_s23, %s2444_s24  ;;  %p2450_p12 = scmp.lt.s32.totalorder %s2444_s24, %s2444_s24 }
  0x3b   :  { %v2099_v10 = vcombine.high %v144_v6, %v148_v7  ;;  %v152_v13 = vld [vmem:[#allocation5 + $0x80] sm:$0xff]  ;;  %1692 = vmatprep.subr.bf16.mxu0 %v2091_v3  ;;  %v2101_v14 = vcombine.high %v145_v11, %v149_v12  ;;  %v153_v16 = vld [vmem:[#allocation5 + $0x88] sm:$0xff]  ;;  %1778 = vmatprep.subr.bf16.mxu1 %v2093_v8  ;;  %v2098_v18 = vcombine.low %v144_v6, %v148_v7 }
  0x3c   :  { %v156_v15 = vld [vmem:[#allocation5 + $0xa0] sm:$0xff]  ;;  %v157_v17 = vld [vmem:[#allocation5 + $0xa8] sm:$0xff]  ;;  %1693 = vmatpush1.bf16.msra.mxu0 %v2090_v5  ;;  %1779 = vmatpush1.bf16.msra.mxu1 %v2092_v9  ;;  %v2100_v19 = vcombine.low %v145_v11, %v149_v12  ;;  %p2451_p13 = por %p2450_p12, %p2449_p11 }
  0x3d   :  { %1694 = vmatprep.subr.bf16.mxu0 %v2099_v10  ;;  %v2107_v20 = vcombine.high %v152_v13, %v156_v15  ;;  %1780 = vmatprep.subr.bf16.mxu1 %v2101_v14  ;;  %v2109_v21 = vcombine.high %v153_v16, %v157_v17  ;;  %v160_v22 = vld [vmem:[#allocation5 + $0xc0] sm:$0xff]  ;;  %v161_v24 = vld [vmem:[#allocation5 + $0xc8] sm:$0xff]  ;;  %v2106_v26 = vcombine.low %v152_v13, %v156_v15 }
  0x3e   :  { %v164_v23 = vld [vmem:[#allocation5 + $0xe0] sm:$0xff]  ;;  %v165_v25 = vld [vmem:[#allocation5 + $0xe8] sm:$0xff]  ;;  %v2108_v27 = vcombine.low %v153_v16, %v157_v17  ;;  %p2452_p0 = pnand %p2451_p13, %p2445_p10 }
  0x3f   :  { %v2115_v28 = vcombine.high %v160_v22, %v164_v23  ;;  %v2117_v29 = vcombine.high %v161_v24, %v165_v25  ;;  %v168_v30 = vld [vmem:[#allocation5 + $0x100] sm:$0xff]  ;;  %v169_v32 = vld [vmem:[#allocation5 + $0x108] sm:$0xff]  ;;  %v2114_v34 = vcombine.low %v160_v22, %v164_v23  ;;  %v2116_v35 = vcombine.low %v161_v24, %v165_v25 }
  0x40   :  { %1695 = vmatpush1.bf16.msra.mxu0 %v2098_v18  ;;  %1781 = vmatpush1.bf16.msra.mxu1 %v2100_v19  ;;  %v172_v31 = vld [vmem:[#allocation5 + $0x120] sm:$0xff]  ;;  %v173_v33 = vld [vmem:[#allocation5 + $0x128] sm:$0xff] }
  0x41   :  { %1696 = vmatprep.subr.bf16.mxu0 %v2107_v20  ;;  %1782 = vmatprep.subr.bf16.mxu1 %v2109_v21  ;;  %v2123_v36 = vcombine.high %v168_v30, %v172_v31  ;;  %v2125_v37 = vcombine.high %v169_v32, %v173_v33  ;;  %v176_v38 = vld [vmem:[#allocation5 + $0x140] sm:$0xff]  ;;  %v177_v40 = vld [vmem:[#allocation5 + $0x148] sm:$0xff]  ;;  %v2122_v42 = vcombine.low %v168_v30, %v172_v31 }
  0x42   :  { %v180_v39 = vld [vmem:[#allocation5 + $0x160] sm:$0xff]  ;;  %v181_v41 = vld [vmem:[#allocation5 + $0x168] sm:$0xff]  ;;  %v2124_v43 = vcombine.low %v169_v32, %v173_v33 }
  0x43   :  { %v2131_v44 = vcombine.high %v176_v38, %v180_v39  ;;  %v2133_v45 = vcombine.high %v177_v40, %v181_v41  ;;  %v184_v46 = vld [vmem:[#allocation5 + $0x180] sm:$0xff]  ;;  %v185_v48 = vld [vmem:[#allocation5 + $0x188] sm:$0xff]  ;;  %v2130_v50 = vcombine.low %v176_v38, %v180_v39  ;;  %v2132_v51 = vcombine.low %v177_v40, %v181_v41 }
  0x44   :  { %1697 = vmatpush1.bf16.msra.mxu0 %v2106_v26  ;;  %1783 = vmatpush1.bf16.msra.mxu1 %v2108_v27  ;;  %v188_v47 = vld [vmem:[#allocation5 + $0x1a0] sm:$0xff]  ;;  %v189_v49 = vld [vmem:[#allocation5 + $0x1a8] sm:$0xff] }
  0x45   :  { %1698 = vmatprep.subr.bf16.mxu0 %v2115_v28  ;;  %1784 = vmatprep.subr.bf16.mxu1 %v2117_v29  ;;  %v2139_v52 = vcombine.high %v184_v46, %v188_v47  ;;  %v2141_v53 = vcombine.high %v185_v48, %v189_v49  ;;  %v192_v54 = vld [vmem:[#allocation5 + $0x1c0] sm:$0xff]  ;;  %v193_v57 = vld [vmem:[#allocation5 + $0x1c8] sm:$0xff]  ;;  %v2138_v59 = vcombine.low %v184_v46, %v188_v47 }
  0x46   :  { %v196_v55 = vld [vmem:[#allocation5 + $0x1e0] sm:$0xff]  ;;  %v197_v58 = vld [vmem:[#allocation5 + $0x1e8] sm:$0xff]  ;;  %v2140_v60 = vcombine.low %v185_v48, %v189_v49 }
  0x47   :  { %v2538_v56 = vld [vmem:[#allocation2 + $0x4] ss:$16 sps:$4 sm:$0xff]   ;;  %v2147_v61 = vcombine.high %v192_v54, %v196_v55  ;;  %v2149_v62 = vcombine.high %v193_v57, %v197_v58  ;;  %v201_v1 = vld [vmem:[#allocation5 + $0x208] sm:$0xff]  ;;  %v2146_v3 = vcombine.low %v192_v54, %v196_v55  ;;  %v2148_v4 = vcombine.low %v193_v57, %v197_v58 }
  0x48   :  { %1699 = vmatpush1.bf16.msra.mxu0 %v2114_v34  ;;  %1785 = vmatpush1.bf16.msra.mxu1 %v2116_v35  ;;  %v200_v63 = vld [vmem:[#allocation5 + $0x200] sm:$0xff]  ;;  %v205_v2 = vld [vmem:[#allocation5 + $0x228] sm:$0xff] }
  0x49   :  { %1700 = vmatprep.subr.bf16.mxu0 %v2123_v36  ;;  %1786 = vmatprep.subr.bf16.mxu1 %v2125_v37  ;;  %v204_v0 = vld [vmem:[#allocation5 + $0x220] sm:$0xff]  ;;  %v2157_v6 = vcombine.high %v201_v1, %v205_v2  ;;  %v209_v9 = vld [vmem:[#allocation5 + $0x248] sm:$0xff]  ;;  %v2156_v12 = vcombine.low %v201_v1, %v205_v2 }
  0x4a   :  { %1724 = vmatprep.mubr.bf16.mxu0 %v2538_v56  ;;  %1810 = vmatprep.mubr.bf16.mxu1 %v2538_v56  ;;  %v2155_v5 = vcombine.high %v200_v63, %v204_v0  ;;  %v208_v7 = vld [vmem:[#allocation5 + $0x240] sm:$0xff]  ;;  %v213_v10 = vld [vmem:[#allocation5 + $0x268] sm:$0xff]  ;;  %v2154_v11 = vcombine.low %v200_v63, %v204_v0 }
  0x4b   :  { %v212_v8 = vld [vmem:[#allocation5 + $0x260] sm:$0xff]  ;;  %v2165_v14 = vcombine.high %v209_v9, %v213_v10  ;;  %v217_v17 = vld [vmem:[#allocation5 + $0x288] sm:$0xff]  ;;  %v2164_v20 = vcombine.low %v209_v9, %v213_v10 }
  0x4c   :  { %1701 = vmatpush1.bf16.msra.mxu0 %v2122_v42  ;;  %1787 = vmatpush1.bf16.msra.mxu1 %v2124_v43  ;;  %v2163_v13 = vcombine.high %v208_v7, %v212_v8  ;;  %v216_v15 = vld [vmem:[#allocation5 + $0x280] sm:$0xff]  ;;  %v221_v18 = vld [vmem:[#allocation5 + $0x2a8] sm:$0xff]  ;;  %v2162_v19 = vcombine.low %v208_v7, %v212_v8 }
  0x4d   :  { %1702 = vmatprep.subr.bf16.mxu0 %v2131_v44  ;;  %1788 = vmatprep.subr.bf16.mxu1 %v2133_v45  ;;  %v220_v16 = vld [vmem:[#allocation5 + $0x2a0] sm:$0xff]  ;;  %v2173_v22 = vcombine.high %v217_v17, %v221_v18  ;;  %v225_v25 = vld [vmem:[#allocation5 + $0x2c8] sm:$0xff]  ;;  %v2172_v28 = vcombine.low %v217_v17, %v221_v18 }
  0x4e   :  { %v2171_v21 = vcombine.high %v216_v15, %v220_v16  ;;  %v224_v23 = vld [vmem:[#allocation5 + $0x2c0] sm:$0xff]  ;;  %v229_v26 = vld [vmem:[#allocation5 + $0x2e8] sm:$0xff]  ;;  %v2170_v27 = vcombine.low %v216_v15, %v220_v16 }
  0x4f   :  { %v228_v24 = vld [vmem:[#allocation5 + $0x2e0] sm:$0xff]  ;;  %v2181_v30 = vcombine.high %v225_v25, %v229_v26  ;;  %v233_v33 = vld [vmem:[#allocation5 + $0x308] sm:$0xff]  ;;  %v2180_v36 = vcombine.low %v225_v25, %v229_v26 }
  0x50   :  { %1703 = vmatpush1.bf16.msra.mxu0 %v2130_v50  ;;  %1789 = vmatpush1.bf16.msra.mxu1 %v2132_v51  ;;  %v2179_v29 = vcombine.high %v224_v23, %v228_v24  ;;  %v232_v31 = vld [vmem:[#allocation5 + $0x300] sm:$0xff]  ;;  %v237_v34 = vld [vmem:[#allocation5 + $0x328] sm:$0xff]  ;;  %v2178_v35 = vcombine.low %v224_v23, %v228_v24 }
  0x51   :  { %1704 = vmatprep.subr.bf16.mxu0 %v2139_v52  ;;  %1790 = vmatprep.subr.bf16.mxu1 %v2141_v53  ;;  %v236_v32 = vld [vmem:[#allocation5 + $0x320] sm:$0xff]  ;;  %v2189_v38 = vcombine.high %v233_v33, %v237_v34  ;;  %v241_v41 = vld [vmem:[#allocation5 + $0x348] sm:$0xff]  ;;  %v2188_v44 = vcombine.low %v233_v33, %v237_v34 }
  0x52   :  { %v2187_v37 = vcombine.high %v232_v31, %v236_v32  ;;  %v240_v39 = vld [vmem:[#allocation5 + $0x340] sm:$0xff]  ;;  %v245_v42 = vld [vmem:[#allocation5 + $0x368] sm:$0xff]  ;;  %v2186_v43 = vcombine.low %v232_v31, %v236_v32 }
  0x53   :  { %v244_v40 = vld [vmem:[#allocation5 + $0x360] sm:$0xff]  ;;  %v2197_v46 = vcombine.high %v241_v41, %v245_v42  ;;  %v249_v49 = vld [vmem:[#allocation5 + $0x388] sm:$0xff]  ;;  %v2196_v52 = vcombine.low %v241_v41, %v245_v42 }
  0x54   :  { %1705 = vmatpush1.bf16.msra.mxu0 %v2138_v59  ;;  %1791 = vmatpush1.bf16.msra.mxu1 %v2140_v60  ;;  %v2195_v45 = vcombine.high %v240_v39, %v244_v40  ;;  %v248_v47 = vld [vmem:[#allocation5 + $0x380] sm:$0xff]  ;;  %v253_v50 = vld [vmem:[#allocation5 + $0x3a8] sm:$0xff]  ;;  %v2194_v51 = vcombine.low %v240_v39, %v244_v40 }
  0x55   :  { %1706 = vmatprep.subr.bf16.mxu0 %v2147_v61  ;;  %1792 = vmatprep.subr.bf16.mxu1 %v2149_v62  ;;  %v252_v48 = vld [vmem:[#allocation5 + $0x3a0] sm:$0xff]  ;;  %v2205_v54 = vcombine.high %v249_v49, %v253_v50  ;;  %v257_v58 = vld [vmem:[#allocation5 + $0x3c8] sm:$0xff]  ;;  %v2204_v61 = vcombine.low %v249_v49, %v253_v50 }
  0x56   :  { %v2203_v53 = vcombine.high %v248_v47, %v252_v48  ;;  %v256_v55 = vld [vmem:[#allocation5 + $0x3c0] sm:$0xff]  ;;  %v261_v59 = vld [vmem:[#allocation5 + $0x3e8] sm:$0xff]  ;;  %v2202_v60 = vcombine.low %v248_v47, %v252_v48 }
  0x57   :  { %v260_v57 = vld [vmem:[#allocation5 + $0x3e0] sm:$0xff]  ;;  %v2213_v63 = vcombine.high %v257_v58, %v261_v59  ;;  %v265_v2 = vld [vmem:[#allocation5 + $0x408] sm:$0xff] }
  0x58   :  { %1707 = vmatpush1.bf16.msra.mxu0 %v2146_v3  ;;  %1793 = vmatpush1.bf16.msra.mxu1 %v2148_v4  ;;  %v2211_v62 = vcombine.high %v256_v55, %v260_v57  ;;  %v264_v0 = vld [vmem:[#allocation5 + $0x400] sm:$0xff]  ;;  %v269_v3 = vld [vmem:[#allocation5 + $0x428] sm:$0xff]  ;;  %v2210_v4 = vcombine.low %v256_v55, %v260_v57 }
  0x59   :  { %1708 = vmatprep.subr.bf16.mxu0 %v2155_v5  ;;  %1794 = vmatprep.subr.bf16.mxu1 %v2157_v6  ;;  %v268_v1 = vld [vmem:[#allocation5 + $0x420] sm:$0xff]  ;;  %v2212_v5 = vcombine.low %v257_v58, %v261_v59  ;;  %v2221_v7 = vcombine.high %v265_v2, %v269_v3 }
  0x5a   :  { %v2219_v6 = vcombine.high %v264_v0, %v268_v1  ;;  %v272_v8 = vld [vmem:[#allocation5 + $0x440] sm:$0xff] }
  0x5b   :  { %v276_v9 = vld [vmem:[#allocation5 + $0x460] sm:$0xff] }
  0x5c   :  { %1709 = vmatpush1.bf16.msra.mxu0 %v2154_v11  ;;  %1795 = vmatpush1.bf16.msra.mxu1 %v2156_v12  ;;  %v2542_v10 = vld [vmem:[#allocation2] ss:$16 sps:$4 sm:$0xff]   ;;  %v273_v11 = vld [vmem:[#allocation5 + $0x448] sm:$0xff]  ;;  %v2227_v15 = vcombine.high %v272_v8, %v276_v9 }
  0x5d   :  { %1710 = vmatprep.subr.bf16.mxu0 %v2163_v13  ;;  %1796 = vmatprep.subr.bf16.mxu1 %v2165_v14  ;;  %v277_v12 = vld [vmem:[#allocation5 + $0x468] sm:$0xff]  ;;  %v2218_v13 = vcombine.low %v264_v0, %v268_v1  ;;  %v2220_v14 = vcombine.low %v265_v2, %v269_v3  ;;  %v280_v17 = vld [vmem:[#allocation5 + $0x480] sm:$0xff] }
  0x5e   :  { %v2229_v16 = vcombine.high %v273_v11, %v277_v12  ;;  %v284_v18 = vld [vmem:[#allocation5 + $0x4a0] sm:$0xff]  ;;  %v2228_v23 = vcombine.low %v273_v11, %v277_v12 }
  0x5f   :  { %v2235_v24 = vcombine.high %v280_v17, %v284_v18  ;;  %v288_v26 = vld [vmem:[#allocation5 + $0x4c0] sm:$0xff] }
  0x60   :  { %1711 = vmatpush1.bf16.msra.mxu0 %v2162_v19  ;;  %1797 = vmatpush1.bf16.msra.mxu1 %v2164_v20  ;;  %v2544_v19 = vld [vmem:[#allocation2 + $0xc] ss:$16 sps:$4 sm:$0xff]   ;;  %v296_v34 = vld [vmem:[#allocation5 + $0x500] sm:$0xff] }
  0x61   :  { %1712 = vmatprep.subr.bf16.mxu0 %v2171_v21  ;;  %1798 = vmatprep.subr.bf16.mxu1 %v2173_v22  ;;  %v281_v20 = vld [vmem:[#allocation5 + $0x488] sm:$0xff]  ;;  %v2226_v22 = vcombine.low %v272_v8, %v276_v9  ;;  %v304_v42 = vld [vmem:[#allocation5 + $0x540] sm:$0xff] }
  0x62   :  { %v285_v21 = vld [vmem:[#allocation5 + $0x4a8] sm:$0xff]  ;;  %v312_v50 = vld [vmem:[#allocation5 + $0x580] sm:$0xff] }
  0x63   :  { %v2237_v25 = vcombine.high %v281_v20, %v285_v21  ;;  %v2236_v31 = vcombine.low %v281_v20, %v285_v21  ;;  %v320_v59 = vld [vmem:[#allocation5 + $0x5c0] sm:$0xff] }
  0x64   :  { %1713 = vmatpush1.bf16.msra.mxu0 %v2170_v27  ;;  %1799 = vmatpush1.bf16.msra.mxu1 %v2172_v28  ;;  %v292_v27 = vld [vmem:[#allocation5 + $0x4e0] sm:$0xff]  ;;  %v289_v28 = vld [vmem:[#allocation5 + $0x4c8] sm:$0xff] }
  0x65   :  { %1714 = vmatprep.subr.bf16.mxu0 %v2179_v29  ;;  %1800 = vmatprep.subr.bf16.mxu1 %v2181_v30  ;;  %v293_v29 = vld [vmem:[#allocation5 + $0x4e8] sm:$0xff]  ;;  %v2234_v30 = vcombine.low %v280_v17, %v284_v18  ;;  %v2243_v32 = vcombine.high %v288_v26, %v292_v27  ;;  %v328_v3 = vld [vmem:[#allocation5 + $0x600] sm:$0xff] }
  0x66   :  { %v2245_v33 = vcombine.high %v289_v28, %v293_v29  ;;  %v2244_v39 = vcombine.low %v289_v28, %v293_v29  ;;  %v336_v12 = vld [vmem:[#allocation5 + $0x640] sm:$0xff] }
  0x67   :  { %v344_v21 = vld [vmem:[#allocation5 + $0x680] sm:$0xff] }
  0x68   :  { %1715 = vmatpush1.bf16.msra.mxu0 %v2178_v35  ;;  %1801 = vmatpush1.bf16.msra.mxu1 %v2180_v36  ;;  %v300_v35 = vld [vmem:[#allocation5 + $0x520] sm:$0xff]  ;;  %v297_v36 = vld [vmem:[#allocation5 + $0x508] sm:$0xff] }
  0x69   :  { %1716 = vmatprep.subr.bf16.mxu0 %v2187_v37  ;;  %1802 = vmatprep.subr.bf16.mxu1 %v2189_v38  ;;  %v301_v37 = vld [vmem:[#allocation5 + $0x528] sm:$0xff]  ;;  %v2242_v38 = vcombine.low %v288_v26, %v292_v27  ;;  %v2251_v40 = vcombine.high %v296_v34, %v300_v35  ;;  %v352_v29 = vld [vmem:[#allocation5 + $0x6c0] sm:$0xff] }
  0x6a   :  { %v2253_v41 = vcombine.high %v297_v36, %v301_v37  ;;  %v2252_v47 = vcombine.low %v297_v36, %v301_v37  ;;  %v360_v37 = vld [vmem:[#allocation5 + $0x700] sm:$0xff] }
  0x6c   :  { %1717 = vmatpush1.bf16.msra.mxu0 %v2186_v43  ;;  %1803 = vmatpush1.bf16.msra.mxu1 %v2188_v44  ;;  %v308_v43 = vld [vmem:[#allocation5 + $0x560] sm:$0xff]  ;;  %v305_v44 = vld [vmem:[#allocation5 + $0x548] sm:$0xff] }
  0x6d   :  { %1718 = vmatprep.subr.bf16.mxu0 %v2195_v45  ;;  %1804 = vmatprep.subr.bf16.mxu1 %v2197_v46  ;;  %v309_v45 = vld [vmem:[#allocation5 + $0x568] sm:$0xff]  ;;  %v2250_v46 = vcombine.low %v296_v34, %v300_v35  ;;  %v2259_v48 = vcombine.high %v304_v42, %v308_v43 }
  0x6e   :  { %v2261_v49 = vcombine.high %v305_v44, %v309_v45  ;;  %v2260_v55 = vcombine.low %v305_v44, %v309_v45  ;;  %v368_v45 = vld [vmem:[#allocation5 + $0x740] sm:$0xff] }
  0x70   :  { %1719 = vmatpush1.bf16.msra.mxu0 %v2194_v51  ;;  %1805 = vmatpush1.bf16.msra.mxu1 %v2196_v52  ;;  %v316_v51 = vld [vmem:[#allocation5 + $0x5a0] sm:$0xff]  ;;  %v313_v52 = vld [vmem:[#allocation5 + $0x588] sm:$0xff] }
  0x71   :  { %1720 = vmatprep.subr.bf16.mxu0 %v2203_v53  ;;  %1806 = vmatprep.subr.bf16.mxu1 %v2205_v54  ;;  %v317_v53 = vld [vmem:[#allocation5 + $0x5a8] sm:$0xff]  ;;  %v2258_v54 = vcombine.low %v304_v42, %v308_v43  ;;  %v2267_v57 = vcombine.high %v312_v50, %v316_v51 }
  0x72   :  { %v2269_v58 = vcombine.high %v313_v52, %v317_v53  ;;  %v2268_v0 = vcombine.low %v313_v52, %v317_v53  ;;  %v376_v53 = vld [vmem:[#allocation5 + $0x780] sm:$0xff] }
  0x74   :  { %1721 = vmatpush1.bf16.msra.mxu0 %v2202_v60  ;;  %1807 = vmatpush1.bf16.msra.mxu1 %v2204_v61  ;;  %v324_v60 = vld [vmem:[#allocation5 + $0x5e0] sm:$0xff]  ;;  %v321_v61 = vld [vmem:[#allocation5 + $0x5c8] sm:$0xff] }
  0x75   :  { %1722 = vmatprep.subr.bf16.mxu0 %v2211_v62  ;;  %1808 = vmatprep.subr.bf16.mxu1 %v2213_v63  ;;  %v325_v62 = vld [vmem:[#allocation5 + $0x5e8] sm:$0xff]  ;;  %v2266_v63 = vcombine.low %v312_v50, %v316_v51  ;;  %v2275_v1 = vcombine.high %v320_v59, %v324_v60 }
  0x76   :  { %v2277_v2 = vcombine.high %v321_v61, %v325_v62  ;;  %v2276_v8 = vcombine.low %v321_v61, %v325_v62  ;;  %v384_v62 = vld [vmem:[#allocation5 + $0x7c0] sm:$0xff] }
  0x78   :  { %1723 = vmatpush1.bf16.msra.mxu0 %v2210_v4  ;;  %1809 = vmatpush1.bf16.msra.mxu1 %v2212_v5  ;;  %v332_v4 = vld [vmem:[#allocation5 + $0x620] sm:$0xff]  ;;  %v329_v5 = vld [vmem:[#allocation5 + $0x608] sm:$0xff] }
  0x79   :  { %1735 = vmatprep.subr.bf16.mxu0 %v2219_v6  ;;  %1821 = vmatprep.subr.bf16.mxu1 %v2221_v7  ;;  %v333_v6 = vld [vmem:[#allocation5 + $0x628] sm:$0xff]  ;;  %v2274_v7 = vcombine.low %v320_v59, %v324_v60  ;;  %v2283_v9 = vcombine.high %v328_v3, %v332_v4 }
  0x7a   :  { %v2285_v11 = vcombine.high %v329_v5, %v333_v6  ;;  %v2284_v17 = vcombine.low %v329_v5, %v333_v6  ;;  %v138_v6 = vld [vmem:[#allocation5 + $0x10] sm:$0xff] }
  0x7b   :  { %1725 = vmatmul.mubr.bf16.vlgmr.msra.gmra.mrb[0].mxu0 %v2542_v10  ;;  %1811 = vmatmul.mubr.bf16.vlgmr.msra.gmra.mrb[0].mxu1 %v2542_v10 }
  0x7c   :  { %1736 = vmatpush1.bf16.msra.mxu0 %v2218_v13  ;;  %1822 = vmatpush1.bf16.msra.mxu1 %v2220_v14  ;;  %v340_v13 = vld [vmem:[#allocation5 + $0x660] sm:$0xff]  ;;  %v337_v14 = vld [vmem:[#allocation5 + $0x648] sm:$0xff] }
  0x7d   :  { %1737 = vmatprep.subr.bf16.mxu0 %v2227_v15  ;;  %1823 = vmatprep.subr.bf16.mxu1 %v2229_v16  ;;  %v341_v15 = vld [vmem:[#allocation5 + $0x668] sm:$0xff]  ;;  %v2282_v16 = vcombine.low %v328_v3, %v332_v4  ;;  %v2291_v18 = vcombine.high %v336_v12, %v340_v13 }
  0x7e   :  { %1767 = vmatprep.mubr.bf16.mxu0 %v2544_v19  ;;  %1853 = vmatprep.mubr.bf16.mxu1 %v2544_v19  ;;  %v2293_v20 = vcombine.high %v337_v14, %v341_v15  ;;  %v2292_v26 = vcombine.low %v337_v14, %v341_v15  ;;  %v146_v15 = vld [vmem:[#allocation5 + $0x50] sm:$0xff] }
  0x80   :  { %1738 = vmatpush1.bf16.msra.mxu0 %v2226_v22  ;;  %1824 = vmatpush1.bf16.msra.mxu1 %v2228_v23  ;;  %v348_v22 = vld [vmem:[#allocation5 + $0x6a0] sm:$0xff]  ;;  %v345_v23 = vld [vmem:[#allocation5 + $0x688] sm:$0xff] }
  0x81   :  { %1739 = vmatprep.subr.bf16.mxu0 %v2235_v24  ;;  %1825 = vmatprep.subr.bf16.mxu1 %v2237_v25  ;;  %v349_v24 = vld [vmem:[#allocation5 + $0x6a8] sm:$0xff]  ;;  %v2290_v25 = vcombine.low %v336_v12, %v340_v13  ;;  %v2299_v27 = vcombine.high %v344_v21, %v348_v22 }
  0x82   :  { %v2301_v28 = vcombine.high %v345_v23, %v349_v24  ;;  %v2300_v34 = vcombine.low %v345_v23, %v349_v24 }
  0x84   :  { %1740 = vmatpush1.bf16.msra.mxu0 %v2234_v30  ;;  %1826 = vmatpush1.bf16.msra.mxu1 %v2236_v31  ;;  %v356_v30 = vld [vmem:[#allocation5 + $0x6e0] sm:$0xff]  ;;  %v353_v31 = vld [vmem:[#allocation5 + $0x6c8] sm:$0xff] }
  0x85   :  { %1741 = vmatprep.subr.bf16.mxu0 %v2243_v32  ;;  %1827 = vmatprep.subr.bf16.mxu1 %v2245_v33  ;;  %v357_v32 = vld [vmem:[#allocation5 + $0x6e8] sm:$0xff]  ;;  %v2298_v33 = vcombine.low %v344_v21, %v348_v22  ;;  %v2307_v35 = vcombine.high %v352_v29, %v356_v30 }
  0x86   :  { %v2309_v36 = vcombine.high %v353_v31, %v357_v32  ;;  %v2308_v42 = vcombine.low %v353_v31, %v357_v32 }
  0x88   :  { %1742 = vmatpush1.bf16.msra.mxu0 %v2242_v38  ;;  %1828 = vmatpush1.bf16.msra.mxu1 %v2244_v39  ;;  %v364_v38 = vld [vmem:[#allocation5 + $0x720] sm:$0xff]  ;;  %v361_v39 = vld [vmem:[#allocation5 + $0x708] sm:$0xff] }
  0x89   :  { %1743 = vmatprep.subr.bf16.mxu0 %v2251_v40  ;;  %1829 = vmatprep.subr.bf16.mxu1 %v2253_v41  ;;  %v365_v40 = vld [vmem:[#allocation5 + $0x728] sm:$0xff]  ;;  %v2306_v41 = vcombine.low %v352_v29, %v356_v30  ;;  %v2315_v43 = vcombine.high %v360_v37, %v364_v38 }
  0x8a   :  { %v2317_v44 = vcombine.high %v361_v39, %v365_v40  ;;  %v2316_v50 = vcombine.low %v361_v39, %v365_v40 }
  0x8c   :  { %1744 = vmatpush1.bf16.msra.mxu0 %v2250_v46  ;;  %1830 = vmatpush1.bf16.msra.mxu1 %v2252_v47  ;;  %v372_v46 = vld [vmem:[#allocation5 + $0x760] sm:$0xff]  ;;  %v369_v47 = vld [vmem:[#allocation5 + $0x748] sm:$0xff] }
  0x8d   :  { %1745 = vmatprep.subr.bf16.mxu0 %v2259_v48  ;;  %1831 = vmatprep.subr.bf16.mxu1 %v2261_v49  ;;  %v373_v48 = vld [vmem:[#allocation5 + $0x768] sm:$0xff]  ;;  %v2314_v49 = vcombine.low %v360_v37, %v364_v38  ;;  %v2323_v51 = vcombine.high %v368_v45, %v372_v46 }
  0x8e   :  { %v2325_v52 = vcombine.high %v369_v47, %v373_v48  ;;  %v2324_v59 = vcombine.low %v369_v47, %v373_v48  ;;  %v178_v48 = vld [vmem:[#allocation5 + $0x150] sm:$0xff] }
  0x90   :  { %1746 = vmatpush1.bf16.msra.mxu0 %v2258_v54  ;;  %1832 = vmatpush1.bf16.msra.mxu1 %v2260_v55  ;;  %v380_v54 = vld [vmem:[#allocation5 + $0x7a0] sm:$0xff]  ;;  %v377_v55 = vld [vmem:[#allocation5 + $0x788] sm:$0xff] }
  0x91   :  { %1747 = vmatprep.subr.bf16.mxu0 %v2267_v57  ;;  %1833 = vmatprep.subr.bf16.mxu1 %v2269_v58  ;;  %v381_v57 = vld [vmem:[#allocation5 + $0x7a8] sm:$0xff]  ;;  %v2322_v58 = vcombine.low %v368_v45, %v372_v46  ;;  %v2331_v60 = vcombine.high %v376_v53, %v380_v54 }
  0x92   :  { %v2333_v61 = vcombine.high %v377_v55, %v381_v57  ;;  %v2332_v3 = vcombine.low %v377_v55, %v381_v57  ;;  %v186_v57 = vld [vmem:[#allocation5 + $0x190] sm:$0xff] }
  0x94   :  { %1748 = vmatpush1.bf16.msra.mxu0 %v2266_v63  ;;  %1834 = vmatpush1.bf16.msra.mxu1 %v2268_v0  ;;  %v388_v63 = vld [vmem:[#allocation5 + $0x7e0] sm:$0xff]  ;;  %v385_v0 = vld [vmem:[#allocation5 + $0x7c8] sm:$0xff] }
  0x95   :  { %1749 = vmatprep.subr.bf16.mxu0 %v2275_v1  ;;  %1835 = vmatprep.subr.bf16.mxu1 %v2277_v2  ;;  %v389_v1 = vld [vmem:[#allocation5 + $0x7e8] sm:$0xff]  ;;  %v2330_v2 = vcombine.low %v376_v53, %v380_v54  ;;  %v2339_v4 = vcombine.high %v384_v62, %v388_v63 }
  0x96   :  { %v2341_v5 = vcombine.high %v385_v0, %v389_v1  ;;  %v2340_v12 = vcombine.low %v385_v0, %v389_v1  ;;  %v194_v1 = vld [vmem:[#allocation5 + $0x1d0] sm:$0xff] }
  0x98   :  { %1750 = vmatpush1.bf16.msra.mxu0 %v2274_v7  ;;  %1836 = vmatpush1.bf16.msra.mxu1 %v2276_v8  ;;  %v142_v7 = vld [vmem:[#allocation5 + $0x30] sm:$0xff]  ;;  %v139_v8 = vld [vmem:[#allocation5 + $0x18] sm:$0xff] }
  0x99   :  { %1751 = vmatprep.subr.bf16.mxu0 %v2283_v9  ;;  %1837 = vmatprep.subr.bf16.mxu1 %v2285_v11  ;;  %v143_v9 = vld [vmem:[#allocation5 + $0x38] sm:$0xff]  ;;  %v2338_v11 = vcombine.low %v384_v62, %v388_v63  ;;  %v2095_v13 = vcombine.high %v138_v6, %v142_v7  ;;  %v2094_v21 = vcombine.low %v138_v6, %v142_v7 }
  0x9a   :  { %v2097_v14 = vcombine.high %v139_v8, %v143_v9  ;;  %v2096_v22 = vcombine.low %v139_v8, %v143_v9  ;;  %v202_v9 = vld [vmem:[#allocation5 + $0x210] sm:$0xff] }
  0x9c   :  { %1752 = vmatpush1.bf16.msra.mxu0 %v2282_v16  ;;  %1838 = vmatpush1.bf16.msra.mxu1 %v2284_v17  ;;  %v150_v16 = vld [vmem:[#allocation5 + $0x70] sm:$0xff]  ;;  %v2550_v17 = vld [vmem:[#allocation2 + $0x8] ss:$16 sps:$4 sm:$0xff]  }
  0x9d   :  { %1753 = vmatprep.subr.bf16.mxu0 %v2291_v18  ;;  %1839 = vmatprep.subr.bf16.mxu1 %v2293_v20  ;;  %v147_v18 = vld [vmem:[#allocation5 + $0x58] sm:$0xff]  ;;  %v2103_v23 = vcombine.high %v146_v15, %v150_v16  ;;  %v2102_v29 = vcombine.low %v146_v15, %v150_v16 }
  0x9e   :  { %v151_v20 = vld [vmem:[#allocation5 + $0x78] sm:$0xff] }
  0x9f   :  { %v2105_v24 = vcombine.high %v147_v18, %v151_v20  ;;  %v2104_v30 = vcombine.low %v147_v18, %v151_v20  ;;  %v210_v20 = vld [vmem:[#allocation5 + $0x250] sm:$0xff] }
  0xa0   :  { %1754 = vmatpush1.bf16.msra.mxu0 %v2290_v25  ;;  %1840 = vmatpush1.bf16.msra.mxu1 %v2292_v26  ;;  %v154_v25 = vld [vmem:[#allocation5 + $0x90] sm:$0xff] }
  0xa1   :  { %1755 = vmatprep.subr.bf16.mxu0 %v2299_v27  ;;  %1841 = vmatprep.subr.bf16.mxu1 %v2301_v28  ;;  %v158_v26 = vld [vmem:[#allocation5 + $0xb0] sm:$0xff]  ;;  %v155_v27 = vld [vmem:[#allocation5 + $0x98] sm:$0xff] }
  0xa2   :  { %v159_v28 = vld [vmem:[#allocation5 + $0xb8] sm:$0xff]  ;;  %v2111_v31 = vcombine.high %v154_v25, %v158_v26  ;;  %v2110_v37 = vcombine.low %v154_v25, %v158_v26 }
  0xa3   :  { %v2113_v32 = vcombine.high %v155_v27, %v159_v28  ;;  %v2112_v38 = vcombine.low %v155_v27, %v159_v28  ;;  %v218_v28 = vld [vmem:[#allocation5 + $0x290] sm:$0xff] }
  0xa4   :  { %1756 = vmatpush1.bf16.msra.mxu0 %v2298_v33  ;;  %1842 = vmatpush1.bf16.msra.mxu1 %v2300_v34  ;;  %v162_v33 = vld [vmem:[#allocation5 + $0xd0] sm:$0xff] }
  0xa5   :  { %1757 = vmatprep.subr.bf16.mxu0 %v2307_v35  ;;  %1843 = vmatprep.subr.bf16.mxu1 %v2309_v36  ;;  %v166_v34 = vld [vmem:[#allocation5 + $0xf0] sm:$0xff]  ;;  %v163_v35 = vld [vmem:[#allocation5 + $0xd8] sm:$0xff] }
  0xa6   :  { %v167_v36 = vld [vmem:[#allocation5 + $0xf8] sm:$0xff]  ;;  %v2119_v39 = vcombine.high %v162_v33, %v166_v34  ;;  %v2118_v45 = vcombine.low %v162_v33, %v166_v34 }
  0xa7   :  { %v2121_v40 = vcombine.high %v163_v35, %v167_v36  ;;  %v2120_v46 = vcombine.low %v163_v35, %v167_v36  ;;  %v226_v36 = vld [vmem:[#allocation5 + $0x2d0] sm:$0xff] }
  0xa8   :  { %1758 = vmatpush1.bf16.msra.mxu0 %v2306_v41  ;;  %1844 = vmatpush1.bf16.msra.mxu1 %v2308_v42  ;;  %v170_v41 = vld [vmem:[#allocation5 + $0x110] sm:$0xff] }
  0xa9   :  { %1759 = vmatprep.subr.bf16.mxu0 %v2315_v43  ;;  %1845 = vmatprep.subr.bf16.mxu1 %v2317_v44  ;;  %v174_v42 = vld [vmem:[#allocation5 + $0x130] sm:$0xff]  ;;  %v171_v43 = vld [vmem:[#allocation5 + $0x118] sm:$0xff] }
  0xaa   :  { %v175_v44 = vld [vmem:[#allocation5 + $0x138] sm:$0xff]  ;;  %v2127_v47 = vcombine.high %v170_v41, %v174_v42 }
  0xab   :  { %v2128_v53 = vcombine.low %v171_v43, %v175_v44 }
  0xac   :  { %1760 = vmatpush1.bf16.msra.mxu0 %v2314_v49  ;;  %1846 = vmatpush1.bf16.msra.mxu1 %v2316_v50  ;;  %v182_v49 = vld [vmem:[#allocation5 + $0x170] sm:$0xff]  ;;  %v179_v50 = vld [vmem:[#allocation5 + $0x158] sm:$0xff] }
  0xad   :  { %1761 = vmatprep.subr.bf16.mxu0 %v2323_v51  ;;  %1847 = vmatprep.subr.bf16.mxu1 %v2325_v52  ;;  %v183_v51 = vld [vmem:[#allocation5 + $0x178] sm:$0xff]  ;;  %v2126_v52 = vcombine.low %v170_v41, %v174_v42  ;;  %v2135_v54 = vcombine.high %v178_v48, %v182_v49 }
  0xae   :  { %v2137_v55 = vcombine.high %v179_v50, %v183_v51  ;;  %v2136_v62 = vcombine.low %v179_v50, %v183_v51  ;;  %v242_v51 = vld [vmem:[#allocation5 + $0x350] sm:$0xff] }
  0xb0   :  { %1762 = vmatpush1.bf16.msra.mxu0 %v2322_v58  ;;  %1848 = vmatpush1.bf16.msra.mxu1 %v2324_v59  ;;  %v190_v58 = vld [vmem:[#allocation5 + $0x1b0] sm:$0xff]  ;;  %v187_v59 = vld [vmem:[#allocation5 + $0x198] sm:$0xff] }
  0xb1   :  { %1763 = vmatprep.subr.bf16.mxu0 %v2331_v60  ;;  %1849 = vmatprep.subr.bf16.mxu1 %v2333_v61  ;;  %v191_v60 = vld [vmem:[#allocation5 + $0x1b8] sm:$0xff]  ;;  %v2134_v61 = vcombine.low %v178_v48, %v182_v49  ;;  %v2143_v63 = vcombine.high %v186_v57, %v190_v58 }
  0xb2   :  { %v2145_v0 = vcombine.high %v187_v59, %v191_v60  ;;  %v2144_v6 = vcombine.low %v187_v59, %v191_v60  ;;  %v250_v60 = vld [vmem:[#allocation5 + $0x390] sm:$0xff] }
  0xb4   :  { %1764 = vmatpush1.bf16.msra.mxu0 %v2330_v2  ;;  %1850 = vmatpush1.bf16.msra.mxu1 %v2332_v3  ;;  %v198_v2 = vld [vmem:[#allocation5 + $0x1f0] sm:$0xff]  ;;  %v195_v3 = vld [vmem:[#allocation5 + $0x1d8] sm:$0xff] }
  0xb5   :  { %1765 = vmatprep.subr.bf16.mxu0 %v2339_v4  ;;  %1851 = vmatprep.subr.bf16.mxu1 %v2341_v5  ;;  %v199_v4 = vld [vmem:[#allocation5 + $0x1f8] sm:$0xff]  ;;  %v2142_v5 = vcombine.low %v186_v57, %v190_v58  ;;  %v2151_v7 = vcombine.high %v194_v1, %v198_v2 }
  0xb6   :  { %v2153_v8 = vcombine.high %v195_v3, %v199_v4  ;;  %v2152_v15 = vcombine.low %v195_v3, %v199_v4  ;;  %v258_v4 = vld [vmem:[#allocation5 + $0x3d0] sm:$0xff] }
  0xb8   :  { %1766 = vmatpush1.bf16.msra.mxu0 %v2338_v11  ;;  %1852 = vmatpush1.bf16.msra.mxu1 %v2340_v12  ;;  %v206_v11 = vld [vmem:[#allocation5 + $0x230] sm:$0xff]  ;;  %v203_v12 = vld [vmem:[#allocation5 + $0x218] sm:$0xff] }
  0xb9   :  { %1864 = vmatprep.subr.bf16.mxu0 %v2095_v13  ;;  %1950 = vmatprep.subr.bf16.mxu1 %v2097_v14  ;;  %v207_v13 = vld [vmem:[#allocation5 + $0x238] sm:$0xff]  ;;  %v2150_v14 = vcombine.low %v194_v1, %v198_v2  ;;  %v2159_v16 = vcombine.high %v202_v9, %v206_v11 }
  0xba   :  { %v2161_v18 = vcombine.high %v203_v12, %v207_v13  ;;  %v2160_v25 = vcombine.low %v203_v12, %v207_v13  ;;  %v266_v13 = vld [vmem:[#allocation5 + $0x410] sm:$0xff] }
  0xbb   :  { %1768 = vmatmul.mubr.bf16.vlgmr.msra.gmra.mrb[0].mxu0 %v2550_v17  ;;  %1854 = vmatmul.mubr.bf16.vlgmr.msra.gmra.mrb[0].mxu1 %v2550_v17 }
  0xbc   :  { %1865 = vmatpush1.bf16.msra.mxu0 %v2094_v21  ;;  %1951 = vmatpush1.bf16.msra.mxu1 %v2096_v22  ;;  %v214_v21 = vld [vmem:[#allocation5 + $0x270] sm:$0xff]  ;;  %v211_v22 = vld [vmem:[#allocation5 + $0x258] sm:$0xff] }
  0xbd   :  { %1866 = vmatprep.subr.bf16.mxu0 %v2103_v23  ;;  %1952 = vmatprep.subr.bf16.mxu1 %v2105_v24  ;;  %v215_v23 = vld [vmem:[#allocation5 + $0x278] sm:$0xff]  ;;  %v2158_v24 = vcombine.low %v202_v9, %v206_v11  ;;  %v2167_v26 = vcombine.high %v210_v20, %v214_v21 }
  0xbe   :  { %1896 = vmatprep.mubr.bf16.mxu0 %v2538_v56  ;;  %1982 = vmatprep.mubr.bf16.mxu1 %v2538_v56  ;;  %v2129_v56 = vcombine.high %v171_v43, %v175_v44  ;;  %v2169_v27 = vcombine.high %v211_v22, %v215_v23  ;;  %v2168_v33 = vcombine.low %v211_v22, %v215_v23  ;;  %v234_v44 = vld [vmem:[#allocation5 + $0x310] sm:$0xff] }
  0xbf   :  { %v274_v23 = vld [vmem:[#allocation5 + $0x450] sm:$0xff] }
  0xc0   :  { %1867 = vmatpush1.bf16.msra.mxu0 %v2102_v29  ;;  %1953 = vmatpush1.bf16.msra.mxu1 %v2104_v30  ;;  %v222_v29 = vld [vmem:[#allocation5 + $0x2b0] sm:$0xff]  ;;  %v219_v30 = vld [vmem:[#allocation5 + $0x298] sm:$0xff] }
  0xc1   :  { %1868 = vmatprep.subr.bf16.mxu0 %v2111_v31  ;;  %1954 = vmatprep.subr.bf16.mxu1 %v2113_v32  ;;  %v223_v31 = vld [vmem:[#allocation5 + $0x2b8] sm:$0xff]  ;;  %v2166_v32 = vcombine.low %v210_v20, %v214_v21  ;;  %v2175_v34 = vcombine.high %v218_v28, %v222_v29 }
  0xc2   :  { %v2177_v35 = vcombine.high %v219_v30, %v223_v31  ;;  %v2176_v41 = vcombine.low %v219_v30, %v223_v31  ;;  %v282_v31 = vld [vmem:[#allocation5 + $0x490] sm:$0xff] }
  0xc4   :  { %1869 = vmatpush1.bf16.msra.mxu0 %v2110_v37  ;;  %1955 = vmatpush1.bf16.msra.mxu1 %v2112_v38  ;;  %v230_v37 = vld [vmem:[#allocation5 + $0x2f0] sm:$0xff]  ;;  %v227_v38 = vld [vmem:[#allocation5 + $0x2d8] sm:$0xff] }
  0xc5   :  { %1870 = vmatprep.subr.bf16.mxu0 %v2119_v39  ;;  %1956 = vmatprep.subr.bf16.mxu1 %v2121_v40  ;;  %v231_v39 = vld [vmem:[#allocation5 + $0x2f8] sm:$0xff]  ;;  %v2174_v40 = vcombine.low %v218_v28, %v222_v29  ;;  %v2183_v42 = vcombine.high %v226_v36, %v230_v37 }
  0xc6   :  { %v2185_v43 = vcombine.high %v227_v38, %v231_v39  ;;  %v2184_v48 = vcombine.low %v227_v38, %v231_v39  ;;  %v290_v39 = vld [vmem:[#allocation5 + $0x4d0] sm:$0xff] }
  0xc8   :  { %1871 = vmatpush1.bf16.msra.mxu0 %v2118_v45  ;;  %1957 = vmatpush1.bf16.msra.mxu1 %v2120_v46  ;;  %v238_v45 = vld [vmem:[#allocation5 + $0x330] sm:$0xff]  ;;  %v235_v46 = vld [vmem:[#allocation5 + $0x318] sm:$0xff] }
  0xc9   :  { %1872 = vmatprep.subr.bf16.mxu0 %v2127_v47  ;;  %1958 = vmatprep.subr.bf16.mxu1 %v2129_v56  ;;  %v239_v47 = vld [vmem:[#allocation5 + $0x338] sm:$0xff]  ;;  %v2182_v56 = vcombine.low %v226_v36, %v230_v37  ;;  %v2191_v49 = vcombine.high %v234_v44, %v238_v45 }
  0xca   :  { %v2193_v50 = vcombine.high %v235_v46, %v239_v47  ;;  %v2192_v57 = vcombine.low %v235_v46, %v239_v47  ;;  %v298_v46 = vld [vmem:[#allocation5 + $0x510] sm:$0xff] }
  0xcb   :  { %v302_v47 = vld [vmem:[#allocation5 + $0x530] sm:$0xff] }
  0xcc   :  { %1873 = vmatpush1.bf16.msra.mxu0 %v2126_v52  ;;  %1959 = vmatpush1.bf16.msra.mxu1 %v2128_v53  ;;  %v246_v52 = vld [vmem:[#allocation5 + $0x370] sm:$0xff]  ;;  %v243_v53 = vld [vmem:[#allocation5 + $0x358] sm:$0xff] }
  0xcd   :  { %1874 = vmatprep.subr.bf16.mxu0 %v2135_v54  ;;  %1960 = vmatprep.subr.bf16.mxu1 %v2137_v55  ;;  %v247_v54 = vld [vmem:[#allocation5 + $0x378] sm:$0xff]  ;;  %v2190_v55 = vcombine.low %v234_v44, %v238_v45  ;;  %v2199_v58 = vcombine.high %v242_v51, %v246_v52 }
  0xce   :  { %v2201_v59 = vcombine.high %v243_v53, %v247_v54  ;;  %v2200_v1 = vcombine.low %v243_v53, %v247_v54  ;;  %v310_v53 = vld [vmem:[#allocation5 + $0x570] sm:$0xff]  ;;  %v307_v54 = vld [vmem:[#allocation5 + $0x558] sm:$0xff] }
  0xd0   :  { %1875 = vmatpush1.bf16.msra.mxu0 %v2134_v61  ;;  %1961 = vmatpush1.bf16.msra.mxu1 %v2136_v62  ;;  %v254_v61 = vld [vmem:[#allocation5 + $0x3b0] sm:$0xff]  ;;  %v251_v62 = vld [vmem:[#allocation5 + $0x398] sm:$0xff] }
  0xd1   :  { %1876 = vmatprep.subr.bf16.mxu0 %v2143_v63  ;;  %1962 = vmatprep.subr.bf16.mxu1 %v2145_v0  ;;  %v255_v63 = vld [vmem:[#allocation5 + $0x3b8] sm:$0xff]  ;;  %v2198_v0 = vcombine.low %v242_v51, %v246_v52  ;;  %v2207_v2 = vcombine.high %v250_v60, %v254_v61  ;;  %v2255_v51 = vcombine.high %v298_v46, %v302_v47  ;;  %v306_v52 = vld [vmem:[#allocation5 + $0x550] sm:$0xff] }
  0xd2   :  { %v2209_v3 = vcombine.high %v251_v62, %v255_v63  ;;  %v2208_v9 = vcombine.low %v251_v62, %v255_v63  ;;  %v318_v62 = vld [vmem:[#allocation5 + $0x5b0] sm:$0xff]  ;;  %v315_v63 = vld [vmem:[#allocation5 + $0x598] sm:$0xff] }
  0xd4   :  { %1877 = vmatpush1.bf16.msra.mxu0 %v2142_v5  ;;  %1963 = vmatpush1.bf16.msra.mxu1 %v2144_v6  ;;  %v262_v5 = vld [vmem:[#allocation5 + $0x3f0] sm:$0xff]  ;;  %v259_v6 = vld [vmem:[#allocation5 + $0x3d8] sm:$0xff] }
  0xd5   :  { %1878 = vmatprep.subr.bf16.mxu0 %v2151_v7  ;;  %1964 = vmatprep.subr.bf16.mxu1 %v2153_v8  ;;  %v263_v7 = vld [vmem:[#allocation5 + $0x3f8] sm:$0xff]  ;;  %v2206_v8 = vcombine.low %v250_v60, %v254_v61  ;;  %v2215_v11 = vcombine.high %v258_v4, %v262_v5  ;;  %v314_v61 = vld [vmem:[#allocation5 + $0x590] sm:$0xff] }
  0xd6   :  { %v2217_v12 = vcombine.high %v259_v6, %v263_v7  ;;  %v2216_v20 = vcombine.low %v259_v6, %v263_v7  ;;  %v326_v6 = vld [vmem:[#allocation5 + $0x5f0] sm:$0xff]  ;;  %v323_v7 = vld [vmem:[#allocation5 + $0x5d8] sm:$0xff] }
  0xd8   :  { %1879 = vmatpush1.bf16.msra.mxu0 %v2150_v14  ;;  %1965 = vmatpush1.bf16.msra.mxu1 %v2152_v15  ;;  %v270_v14 = vld [vmem:[#allocation5 + $0x430] sm:$0xff]  ;;  %v267_v15 = vld [vmem:[#allocation5 + $0x418] sm:$0xff] }
  0xd9   :  { %1880 = vmatprep.subr.bf16.mxu0 %v2159_v16  ;;  %1966 = vmatprep.subr.bf16.mxu1 %v2161_v18  ;;  %v271_v16 = vld [vmem:[#allocation5 + $0x438] sm:$0xff]  ;;  %v2214_v18 = vcombine.low %v258_v4, %v262_v5  ;;  %v2223_v21 = vcombine.high %v266_v13, %v270_v14  ;;  %v322_v5 = vld [vmem:[#allocation5 + $0x5d0] sm:$0xff] }
  0xda   :  { %v2225_v22 = vcombine.high %v267_v15, %v271_v16  ;;  %v2224_v28 = vcombine.low %v267_v15, %v271_v16  ;;  %v334_v15 = vld [vmem:[#allocation5 + $0x630] sm:$0xff]  ;;  %v331_v16 = vld [vmem:[#allocation5 + $0x618] sm:$0xff] }
  0xdc   :  { %1881 = vmatpush1.bf16.msra.mxu0 %v2158_v24  ;;  %1967 = vmatpush1.bf16.msra.mxu1 %v2160_v25  ;;  %v278_v24 = vld [vmem:[#allocation5 + $0x470] sm:$0xff]  ;;  %v275_v25 = vld [vmem:[#allocation5 + $0x458] sm:$0xff] }
  0xdd   :  { %1882 = vmatprep.subr.bf16.mxu0 %v2167_v26  ;;  %1968 = vmatprep.subr.bf16.mxu1 %v2169_v27  ;;  %v279_v26 = vld [vmem:[#allocation5 + $0x478] sm:$0xff]  ;;  %v2222_v27 = vcombine.low %v266_v13, %v270_v14  ;;  %v2231_v29 = vcombine.high %v274_v23, %v278_v24  ;;  %v330_v14 = vld [vmem:[#allocation5 + $0x610] sm:$0xff] }
  0xde   :  { %v2233_v30 = vcombine.high %v275_v25, %v279_v26  ;;  %v2232_v36 = vcombine.low %v275_v25, %v279_v26  ;;  %v342_v25 = vld [vmem:[#allocation5 + $0x670] sm:$0xff]  ;;  %v339_v26 = vld [vmem:[#allocation5 + $0x658] sm:$0xff] }
  0xe0   :  { %1883 = vmatpush1.bf16.msra.mxu0 %v2166_v32  ;;  %1969 = vmatpush1.bf16.msra.mxu1 %v2168_v33  ;;  %v286_v32 = vld [vmem:[#allocation5 + $0x4b0] sm:$0xff]  ;;  %v283_v33 = vld [vmem:[#allocation5 + $0x498] sm:$0xff] }
  0xe1   :  { %1884 = vmatprep.subr.bf16.mxu0 %v2175_v34  ;;  %1970 = vmatprep.subr.bf16.mxu1 %v2177_v35  ;;  %v287_v34 = vld [vmem:[#allocation5 + $0x4b8] sm:$0xff]  ;;  %v2230_v35 = vcombine.low %v274_v23, %v278_v24  ;;  %v2239_v37 = vcombine.high %v282_v31, %v286_v32  ;;  %v338_v24 = vld [vmem:[#allocation5 + $0x650] sm:$0xff] }
  0xe2   :  { %v2241_v38 = vcombine.high %v283_v33, %v287_v34 }
  0xe4   :  { %1885 = vmatpush1.bf16.msra.mxu0 %v2174_v40  ;;  %1971 = vmatpush1.bf16.msra.mxu1 %v2176_v41  ;;  %v294_v40 = vld [vmem:[#allocation5 + $0x4f0] sm:$0xff]  ;;  %v291_v41 = vld [vmem:[#allocation5 + $0x4d8] sm:$0xff] }
  0xe5   :  { %1886 = vmatprep.subr.bf16.mxu0 %v2183_v42  ;;  %1972 = vmatprep.subr.bf16.mxu1 %v2185_v43  ;;  %v295_v42 = vld [vmem:[#allocation5 + $0x4f8] sm:$0xff]  ;;  %v2238_v43 = vcombine.low %v282_v31, %v286_v32  ;;  %v2247_v44 = vcombine.high %v290_v39, %v294_v40  ;;  %v346_v32 = vld [vmem:[#allocation5 + $0x690] sm:$0xff] }
  0xe6   :  { %v2249_v45 = vcombine.high %v291_v41, %v295_v42 }
  0xe8   :  { %1887 = vmatpush1.bf16.msra.mxu0 %v2182_v56  ;;  %1973 = vmatpush1.bf16.msra.mxu1 %v2184_v48  ;;  %v299_v56 = vld [vmem:[#allocation5 + $0x518] sm:$0xff] }
  0xe9   :  { %1888 = vmatprep.subr.bf16.mxu0 %v2191_v49  ;;  %1974 = vmatprep.subr.bf16.mxu1 %v2193_v50  ;;  %v303_v48 = vld [vmem:[#allocation5 + $0x538] sm:$0xff]  ;;  %v2246_v49 = vcombine.low %v290_v39, %v294_v40  ;;  %v2248_v50 = vcombine.low %v291_v41, %v295_v42  ;;  %v354_v40 = vld [vmem:[#allocation5 + $0x6d0] sm:$0xff] }
  0xea   :  { %v358_v41 = vld [vmem:[#allocation5 + $0x6f0] sm:$0xff]  ;;  %v355_v42 = vld [vmem:[#allocation5 + $0x6d8] sm:$0xff] }
  0xec   :  { %1889 = vmatpush1.bf16.msra.mxu0 %v2190_v55  ;;  %1975 = vmatpush1.bf16.msra.mxu1 %v2192_v57  ;;  %v311_v55 = vld [vmem:[#allocation5 + $0x578] sm:$0xff]  ;;  %v2254_v57 = vcombine.low %v298_v46, %v302_v47  ;;  %v362_v47 = vld [vmem:[#allocation5 + $0x710] sm:$0xff] }
  0xed   :  { %1890 = vmatprep.subr.bf16.mxu0 %v2199_v58  ;;  %1976 = vmatprep.subr.bf16.mxu1 %v2201_v59  ;;  %v2256_v58 = vcombine.low %v299_v56, %v303_v48  ;;  %v2263_v59 = vcombine.high %v306_v52, %v310_v53  ;;  %v2265_v60 = vcombine.high %v307_v54, %v311_v55 }
  0xf0   :  { %1891 = vmatpush1.bf16.msra.mxu0 %v2198_v0  ;;  %1977 = vmatpush1.bf16.msra.mxu1 %v2200_v1  ;;  %v319_v0 = vld [vmem:[#allocation5 + $0x5b8] sm:$0xff]  ;;  %v2262_v1 = vcombine.low %v306_v52, %v310_v53  ;;  %v370_v53 = vld [vmem:[#allocation5 + $0x750] sm:$0xff] }
  0xf1   :  { %1892 = vmatprep.subr.bf16.mxu0 %v2207_v2  ;;  %1978 = vmatprep.subr.bf16.mxu1 %v2209_v3  ;;  %v2264_v2 = vcombine.low %v307_v54, %v311_v55  ;;  %v2271_v3 = vcombine.high %v314_v61, %v318_v62  ;;  %v2273_v4 = vcombine.high %v315_v63, %v319_v0  ;;  %v374_v54 = vld [vmem:[#allocation5 + $0x770] sm:$0xff]  ;;  %v371_v55 = vld [vmem:[#allocation5 + $0x758] sm:$0xff] }
  0xf4   :  { %1893 = vmatpush1.bf16.msra.mxu0 %v2206_v8  ;;  %1979 = vmatpush1.bf16.msra.mxu1 %v2208_v9  ;;  %v327_v8 = vld [vmem:[#allocation5 + $0x5f8] sm:$0xff]  ;;  %v2270_v9 = vcombine.low %v314_v61, %v318_v62  ;;  %v378_v62 = vld [vmem:[#allocation5 + $0x790] sm:$0xff] }
  0xf5   :  { %1894 = vmatprep.subr.bf16.mxu0 %v2215_v11  ;;  %1980 = vmatprep.subr.bf16.mxu1 %v2217_v12  ;;  %v2272_v11 = vcombine.low %v315_v63, %v319_v0  ;;  %v2279_v12 = vcombine.high %v322_v5, %v326_v6  ;;  %v2281_v13 = vcombine.high %v323_v7, %v327_v8  ;;  %v382_v63 = vld [vmem:[#allocation5 + $0x7b0] sm:$0xff]  ;;  %v379_v0 = vld [vmem:[#allocation5 + $0x798] sm:$0xff] }
  0xf8   :  { %1895 = vmatpush1.bf16.msra.mxu0 %v2214_v18  ;;  %1981 = vmatpush1.bf16.msra.mxu1 %v2216_v20  ;;  %v335_v18 = vld [vmem:[#allocation5 + $0x638] sm:$0xff]  ;;  %v2278_v20 = vcombine.low %v322_v5, %v326_v6  ;;  %v386_v6 = vld [vmem:[#allocation5 + $0x7d0] sm:$0xff] }
  0xf9   :  { %1907 = vmatprep.subr.bf16.mxu0 %v2223_v21  ;;  %1993 = vmatprep.subr.bf16.mxu1 %v2225_v22  ;;  %v2280_v21 = vcombine.low %v323_v7, %v327_v8  ;;  %v2287_v22 = vcombine.high %v330_v14, %v334_v15  ;;  %v2289_v23 = vcombine.high %v331_v16, %v335_v18  ;;  %v390_v7 = vld [vmem:[#allocation5 + $0x7f0] sm:$0xff]  ;;  %v387_v8 = vld [vmem:[#allocation5 + $0x7d8] sm:$0xff] }
  0xfb   :  { %1897 = vmatmul.mubr.bf16.vlgmr.msra.gmra.mrb[4].mxu0 %v2542_v10  ;;  %1983 = vmatmul.mubr.bf16.vlgmr.msra.gmra.mrb[4].mxu1 %v2542_v10  ;;  %v2240_v10 = vcombine.low %v283_v33, %v287_v34  ;;  %v350_v33 = vld [vmem:[#allocation5 + $0x6b0] sm:$0xff]  ;;  %v347_v34 = vld [vmem:[#allocation5 + $0x698] sm:$0xff] }
  0xfc   :  { %1908 = vmatpush1.bf16.msra.mxu0 %v2222_v27  ;;  %1994 = vmatpush1.bf16.msra.mxu1 %v2224_v28  ;;  %v343_v27 = vld [vmem:[#allocation5 + $0x678] sm:$0xff]  ;;  %v2286_v28 = vcombine.low %v330_v14, %v334_v15  ;;  %v2342_v15 = vcombine.low %v386_v6, %v390_v7 }
  0xfd   :  { %1909 = vmatprep.subr.bf16.mxu0 %v2231_v29  ;;  %1995 = vmatprep.subr.bf16.mxu1 %v2233_v30  ;;  %v2288_v29 = vcombine.low %v331_v16, %v335_v18  ;;  %v2295_v30 = vcombine.high %v338_v24, %v342_v25  ;;  %v2297_v31 = vcombine.high %v339_v26, %v343_v27  ;;  %v60_v18 = vlaneseq }
  0xfe   :  { %1939 = vmatprep.mubr.bf16.mxu0 %v2544_v19  ;;  %2025 = vmatprep.mubr.bf16.mxu1 %v2544_v19  ;;  %v2257_v19 = vcombine.high %v299_v56, %v303_v48  ;;  %v366_v56 = vld [vmem:[#allocation5 + $0x730] sm:$0xff]  ;;  %v363_v48 = vld [vmem:[#allocation5 + $0x718] sm:$0xff] }
 0x100   :  { %1910 = vmatpush1.bf16.msra.mxu0 %v2230_v35  ;;  %1996 = vmatpush1.bf16.msra.mxu1 %v2232_v36  ;;  %v351_v35 = vld [vmem:[#allocation5 + $0x6b8] sm:$0xff]  ;;  %v2294_v36 = vcombine.low %v338_v24, %v342_v25 }
 0x101   :  { %1911 = vmatprep.subr.bf16.mxu0 %v2239_v37  ;;  %1997 = vmatprep.subr.bf16.mxu1 %v2241_v38  ;;  %v2296_v37 = vcombine.low %v339_v26, %v343_v27  ;;  %v2303_v38 = vcombine.high %v346_v32, %v350_v33  ;;  %v2305_v39 = vcombine.high %v347_v34, %v351_v35 }
 0x104   :  { %1912 = vmatpush1.bf16.msra.mxu0 %v2238_v43  ;;  %1998 = vmatpush1.bf16.msra.mxu1 %v2240_v10  ;;  %v359_v43 = vld [vmem:[#allocation5 + $0x6f8] sm:$0xff]  ;;  %v2302_v10 = vcombine.low %v346_v32, %v350_v33 }
 0x105   :  { %1913 = vmatprep.subr.bf16.mxu0 %v2247_v44  ;;  %1999 = vmatprep.subr.bf16.mxu1 %v2249_v45  ;;  %v2304_v44 = vcombine.low %v347_v34, %v351_v35  ;;  %v2311_v45 = vcombine.high %v354_v40, %v358_v41  ;;  %v2313_v46 = vcombine.high %v355_v42, %v359_v43 }
 0x108   :  { %1914 = vmatpush1.bf16.msra.mxu0 %v2246_v49  ;;  %2000 = vmatpush1.bf16.msra.mxu1 %v2248_v50  ;;  %v367_v49 = vld [vmem:[#allocation5 + $0x738] sm:$0xff]  ;;  %v2310_v50 = vcombine.low %v354_v40, %v358_v41 }
 0x109   :  { %1915 = vmatprep.subr.bf16.mxu0 %v2255_v51  ;;  %2001 = vmatprep.subr.bf16.mxu1 %v2257_v19  ;;  %v2312_v51 = vcombine.low %v355_v42, %v359_v43  ;;  %v2319_v19 = vcombine.high %v362_v47, %v366_v56  ;;  %v2321_v52 = vcombine.high %v363_v48, %v367_v49 }
 0x10c   :  { %1916 = vmatpush1.bf16.msra.mxu0 %v2254_v57  ;;  %2002 = vmatpush1.bf16.msra.mxu1 %v2256_v58  ;;  %v375_v57 = vld [vmem:[#allocation5 + $0x778] sm:$0xff]  ;;  %v2318_v58 = vcombine.low %v362_v47, %v366_v56 }
 0x10d   :  { %1917 = vmatprep.subr.bf16.mxu0 %v2263_v59  ;;  %2003 = vmatprep.subr.bf16.mxu1 %v2265_v60  ;;  %v2320_v59 = vcombine.low %v363_v48, %v367_v49  ;;  %v2327_v60 = vcombine.high %v370_v53, %v374_v54  ;;  %v2329_v61 = vcombine.high %v371_v55, %v375_v57 }
 0x110   :  { %1918 = vmatpush1.bf16.msra.mxu0 %v2262_v1  ;;  %2004 = vmatpush1.bf16.msra.mxu1 %v2264_v2  ;;  %v383_v1 = vld [vmem:[#allocation5 + $0x7b8] sm:$0xff]  ;;  %v2326_v2 = vcombine.low %v370_v53, %v374_v54 }
 0x111   :  { %1919 = vmatprep.subr.bf16.mxu0 %v2271_v3  ;;  %2005 = vmatprep.subr.bf16.mxu1 %v2273_v4  ;;  %v2328_v3 = vcombine.low %v371_v55, %v375_v57  ;;  %v2335_v4 = vcombine.high %v378_v62, %v382_v63  ;;  %v2337_v5 = vcombine.high %v379_v0, %v383_v1 }
 0x114   :  { %1920 = vmatpush1.bf16.msra.mxu0 %v2270_v9  ;;  %2006 = vmatpush1.bf16.msra.mxu1 %v2272_v11  ;;  %v391_v9 = vld [vmem:[#allocation5 + $0x7f8] sm:$0xff]  ;;  %v2334_v11 = vcombine.low %v378_v62, %v382_v63 }
 0x115   :  { %1921 = vmatprep.subr.bf16.mxu0 %v2279_v12  ;;  %2007 = vmatprep.subr.bf16.mxu1 %v2281_v13  ;;  %v2336_v12 = vcombine.low %v379_v0, %v383_v1  ;;  %v2343_v13 = vcombine.high %v386_v6, %v390_v7  ;;  %v2345_v14 = vcombine.high %v387_v8, %v391_v9 }
 0x116   :  { %v2344_v16 = vcombine.low %v387_v8, %v391_v9 }
 0x118   :  { %1922 = vmatpush1.bf16.msra.mxu0 %v2278_v20  ;;  %2008 = vmatpush1.bf16.msra.mxu1 %v2280_v21  ;;  %v61_v20 = vshrl.u32 %v60_v18, 7 }
 0x119   :  { %1923 = vmatprep.subr.bf16.mxu0 %v2287_v22  ;;  %2009 = vmatprep.subr.bf16.mxu1 %v2289_v23  ;;  %v58_v22 = vld [vmem:[#allocation7] sm:$0xff] }
 0x11a   :  { %v62_v21 = vsub.s32 0, %v61_v20  ;;  %v70_v23 = vsub.s32 2, %v61_v20  ;;  %v66_v24 = vsub.s32 1, %v61_v20  ;;  %v74_v25 = vsub.s32 3, %v61_v20 }
 0x11b   :  { %v90_v47 = vsub.s32 7, %v61_v20 }
 0x11c   :  { %1924 = vmatpush1.bf16.msra.mxu0 %v2286_v28  ;;  %2010 = vmatpush1.bf16.msra.mxu1 %v2288_v29  ;;  %v63_v26 = vrot.slane %v58_v22, %v62_v21  ;;  %v71_v27 = vrot.slane %v58_v22, %v70_v23  ;;  %v67_v28 = vrot.slane %v58_v22, %v66_v24 }
 0x11d   :  { %1925 = vmatprep.subr.bf16.mxu0 %v2295_v30  ;;  %2011 = vmatprep.subr.bf16.mxu1 %v2297_v31  ;;  %v75_v29 = vrot.slane %v58_v22, %v74_v25 }
 0x120   :  { %1926 = vmatpush1.bf16.msra.mxu0 %v2294_v36  ;;  %2012 = vmatpush1.bf16.msra.mxu1 %v2296_v37 }
 0x121   :  { %1927 = vmatprep.subr.bf16.mxu0 %v2303_v38  ;;  %2013 = vmatprep.subr.bf16.mxu1 %v2305_v39 }
 0x124   :  { %1928 = vmatpush1.bf16.msra.mxu0 %v2302_v10  ;;  %2014 = vmatpush1.bf16.msra.mxu1 %v2304_v44  ;;  %v78_v44 = vsub.s32 4, %v61_v20 }
 0x125   :  { %1929 = vmatprep.subr.bf16.mxu0 %v2311_v45  ;;  %2015 = vmatprep.subr.bf16.mxu1 %v2313_v46  ;;  %v86_v45 = vsub.s32 6, %v61_v20  ;;  %v82_v46 = vsub.s32 5, %v61_v20 }
 0x126   :  { %v79_v56 = vrot.slane %v58_v22, %v78_v44 }
 0x127   :  { %v87_v48 = vrot.slane %v58_v22, %v86_v45  ;;  %v83_v49 = vrot.slane %v58_v22, %v82_v46 }
 0x128   :  { %1930 = vmatpush1.bf16.msra.mxu0 %v2310_v50  ;;  %2016 = vmatpush1.bf16.msra.mxu1 %v2312_v51  ;;  %v91_v50 = vrot.slane %v58_v22, %v90_v47 }
 0x129   :  { %1931 = vmatprep.subr.bf16.mxu0 %v2319_v19  ;;  %2017 = vmatprep.subr.bf16.mxu1 %v2321_v52 }
 0x12c   :  { %1932 = vmatpush1.bf16.msra.mxu0 %v2318_v58  ;;  %2018 = vmatpush1.bf16.msra.mxu1 %v2320_v59 }
 0x12d   :  { %1933 = vmatprep.subr.bf16.mxu0 %v2327_v60  ;;  %2019 = vmatprep.subr.bf16.mxu1 %v2329_v61 }
 0x130   :  { %1934 = vmatpush1.bf16.msra.mxu0 %v2326_v2  ;;  %2020 = vmatpush1.bf16.msra.mxu1 %v2328_v3 }
 0x131   :  { %1935 = vmatprep.subr.bf16.mxu0 %v2335_v4  ;;  %2021 = vmatprep.subr.bf16.mxu1 %v2337_v5 }
 0x134   :  { %1936 = vmatpush1.bf16.msra.mxu0 %v2334_v11  ;;  %2022 = vmatpush1.bf16.msra.mxu1 %v2336_v12 }
 0x135   :  { %1937 = vmatprep.subr.bf16.mxu0 %v2343_v13  ;;  %2023 = vmatprep.subr.bf16.mxu1 %v2345_v14 }
 0x138   :  { %1938 = vmatpush1.bf16.msra.mxu0 %v2342_v15  ;;  %2024 = vmatpush1.bf16.msra.mxu1 %v2344_v16 }
 0x13b   :  { %1940 = vmatmul.mubr.bf16.vlgmr.msra.gmra.mrb[4].mxu0 %v2550_v17  ;;  %2026 = vmatmul.mubr.bf16.vlgmr.msra.gmra.mrb[4].mxu1 %v2550_v17 }
 0x18e   :  { %v1769_v30 = vpop.f32.mrb[0].mxu0  ;;  %v1855_v32 = vpop.f32.mrb[0].mxu1 }
 0x18f   :  { %v2036_v31 = vadd.f32 %v1769_v30, %v63_v26  ;;  %v1771_v33 = vpop.f32.mrb[1].mxu0  ;;  %v2038_v34 = vadd.f32 %v1855_v32, %v71_v27  ;;  %v1857_v36 = vpop.f32.mrb[1].mxu1 }
 0x190   :  { %v2037_v35 = vadd.f32 %v1771_v33, %v67_v28  ;;  %v1773_v37 = vpop.f32.mrb[2].mxu0  ;;  %v2039_v17 = vadd.f32 %v1857_v36, %v75_v29  ;;  %v1859_v39 = vpop.f32.mrb[2].mxu1 }
 0x191   :  { %2052 = vst [vmem:[#allocation8] sm:$0xff] %v2036_v31  ;;  %v2044_v38 = vadd.f32 %v1773_v37, %v63_v26  ;;  %v1775_v40 = vpop.f32.mrb[3].mxu0  ;;  %2054 = vst [vmem:[#allocation8 + $0x10] sm:$0xff] %v2038_v34  ;;  %v2046_v41 = vadd.f32 %v1859_v39, %v71_v27  ;;  %v1861_v43 = vpop.f32.mrb[3].mxu1 }
 0x192   :  { %2053 = vst [vmem:[#allocation8 + $0x8] sm:$0xff] %v2037_v35  ;;  %v2045_v42 = vadd.f32 %v1775_v40, %v67_v28  ;;  %2055 = vst [vmem:[#allocation8 + $0x18] sm:$0xff] %v2039_v17  ;;  %v2047_v10 = vadd.f32 %v1861_v43, %v75_v29 }
 0x193   :  { %2060 = vst [vmem:[#allocation8 + $0x40] sm:$0xff] %v2044_v38  ;;  %2062 = vst [vmem:[#allocation8 + $0x50] sm:$0xff] %v2046_v41 }
 0x194   :  { %2061 = vst [vmem:[#allocation8 + $0x48] sm:$0xff] %v2045_v42  ;;  %2063 = vst [vmem:[#allocation8 + $0x58] sm:$0xff] %v2047_v10 }
 0x20e   :  { %v1941_v51 = vpop.f32.mrb[4].mxu0  ;;  %v2027_v52 = vpop.f32.mrb[4].mxu1 }
 0x20f   :  { %v2040_v19 = vadd.f32 %v1941_v51, %v79_v56  ;;  %v1943_v53 = vpop.f32.mrb[5].mxu0  ;;  %v2042_v54 = vadd.f32 %v2027_v52, %v87_v48  ;;  %v2029_v57 = vpop.f32.mrb[5].mxu1 }
 0x210   :  { %v2041_v55 = vadd.f32 %v1943_v53, %v83_v49  ;;  %v1945_v58 = vpop.f32.mrb[6].mxu0  ;;  %v2043_v59 = vadd.f32 %v2029_v57, %v91_v50  ;;  %v2031_v61 = vpop.f32.mrb[6].mxu1 }
 0x211   :  { %2056 = vst [vmem:[#allocation8 + $0x20] sm:$0xff] %v2040_v19  ;;  %v2048_v60 = vadd.f32 %v1945_v58, %v79_v56  ;;  %v1947_v62 = vpop.f32.mrb[7].mxu0  ;;  %2058 = vst [vmem:[#allocation8 + $0x30] sm:$0xff] %v2042_v54  ;;  %v2050_v63 = vadd.f32 %v2031_v61, %v87_v48  ;;  %v2033_v1 = vpop.f32.mrb[7].mxu1 }
 0x212   :  { %2057 = vst [vmem:[#allocation8 + $0x28] sm:$0xff] %v2041_v55  ;;  %v2049_v0 = vadd.f32 %v1947_v62, %v83_v49  ;;  %2059 = vst [vmem:[#allocation8 + $0x38] sm:$0xff] %v2043_v59  ;;  %v2051_v2 = vadd.f32 %v2033_v1, %v91_v50 }
 0x213   :  { %2064 = vst [vmem:[#allocation8 + $0x60] sm:$0xff] %v2048_v60  ;;  %2066 = vst [vmem:[#allocation8 + $0x70] sm:$0xff] %v2050_v63 }
 0x214   :  { %2065 = vst [vmem:[#allocation8 + $0x68] sm:$0xff] %v2049_v0  ;;  %2067 = vst [vmem:[#allocation8 + $0x78] sm:$0xff] %v2051_v2 }
 0x215   :  { %2455 = shalt.err (!%p2452_p0)
}
 0x216   :  { %s2456_s27 = scalar_lea.hbm %s2577_s3, 2048 }
 0x217   :  { %p2457_p1 = scmp.ne.s32.totalorder %s2577_s3, %s2456_s27  ;;  %p2460_p2 = scmp.lt.u32.totalorder %s2456_s27, %s2577_s3 }
 0x219   :  { %p2462_p3 = pnand %p2460_p2, %p2457_p1 }
 0x21b   :  { %2465 = shalt.err (!%p2462_p3)
}
 0x21c   :  { %s2480_s5 = smov 1024   ;;  %s2481_s6 = smov 64  }
 0x21d   :  { %2079 = dma.vmem_to_hbm [thread:$0]  %s2074_s23, 2048, %s2577_s3, [#allocation4], %s2480_s5, %s2480_s5, %s2481_s6  }
 0x21e   :  { %2470 = dma.done.wait [#allocation4], 2048  }
 0x21f   :  { %2471 = vsyncadd [#allocation4], 4294965248 }
 0x220   :  { %2083 = vsyncpa [#allocation3], 1 }
 0x221   :  { %2084 = vsyncpa [#allocation6], 1 }
 0x222   :  { %2085 = vsyncpa [#allocation4], 1 }

</bundles_post_ra>
